<compile_context>
chip_gen: v6e
topology: v6e:2x2x1
jax: 0.10.0
libtpu: 0.0.40
codegen_flags: <defaults>
</compile_context>

<pallas_src>
import numpy as np
import jax
import jax.numpy as jnp
from jax.experimental import pallas as pl
from jax.experimental.pallas import tpu as pltpu


def _num_chunks(rows, row_bytes, target_bytes=8 << 20, max_chunks=8):
    """Enough chunks that each DMA is <= ~target_bytes, capped so we never
    issue more descriptors than rows (and never more than max_chunks)."""
    total = rows * row_bytes
    want = -(-total // target_bytes)  # ceil-div
    return max(1, min(max_chunks, rows, want))


def _make_hbm_copy_kernel(rows, n_chunks, chunk_rows):
    """Kernel body: direct HBM->HBM chunked copy, all DMAs in flight before
    any wait.  No VMEM staging, no vector loads/stores."""

    def kernel(x_hbm, o_hbm, sem):
        copies = []
        for c in range(n_chunks):  # static trace-time loop
            start = c * chunk_rows
            size = min(chunk_rows, rows - start)
            cp = pltpu.make_async_copy(
                x_hbm.at[pl.ds(start, size), :],
                o_hbm.at[pl.ds(start, size), :],
                sem.at[c],
            )
            cp.start()
            copies.append(cp)
        for cp in copies:
            cp.wait()

    return kernel


def decoder_forward(x, state):
    """Pass-through decoder forward implemented as a Pallas HBM->HBM copy.

    x:     [B, S, H]
    state: [B, H]   (returned unchanged; a concrete decoder subclass would
                     actually consume/update it)
    returns (x_copy, state)
    """
    B, S, H = x.shape
    assert state.shape[0] == B

    itemsize = jnp.dtype(x.dtype).itemsize
    total_bytes = B * S * H * itemsize

    # Flatten to 2D for simple row-chunked DMAs.  Layout does not matter for a
    # pure DMA copy (no vector stores), so no padding / lane alignment needed.
    rows = B * S
    x2d = x.reshape(rows, H)
    row_bytes = H * itemsize

    n_chunks = _num_chunks(rows, row_bytes)
    chunk_rows = -(-rows // n_chunks)  # ceil-div; last chunk may be shorter

    kernel = _make_hbm_copy_kernel(rows, n_chunks, chunk_rows)

    y2d = pl.pallas_call(
        kernel,
        out_shape=jax.ShapeDtypeStruct(x2d.shape, x2d.dtype),
        in_specs=[pl.BlockSpec(memory_space=pl.ANY)],
        out_specs=pl.BlockSpec(memory_space=pl.ANY),
        scratch_shapes=[pltpu.SemaphoreType.DMA((n_chunks,))],
        # Pure memory-bound custom call: 1 read + 1 write of the whole array.
        cost_estimate=pl.CostEstimate(
            flops=0, transcendentals=0, bytes_accessed=2 * total_bytes
        ),
    )(x2d)

    y = y2d.reshape(B, S, H)
    # state is passed through untouched — no HBM round-trip needed.
    return y, state


if __name__ == "__main__":
    key = jax.random.PRNGKey(0)
    kx, ks = jax.random.split(key)

    B, S, H = 2, 8, 32  # small shapes consistent with a decoder interface
    x = jax.random.normal(kx, (B, S, H), dtype=jnp.float32)
    state = jax.random.normal(ks, (B, H), dtype=jnp.float32)

    x_host = np.asarray(x)
    state_host = np.asarray(state)

    y, new_state = decoder_forward(x, state)
    jax.block_until_ready((y, new_state))

    # sanity: pass-through semantics
    assert y.shape == (B, S, H) and new_state.shape == (B, H)
    assert np.allclose(np.asarray(y), x_host)
    assert np.allclose(np.asarray(new_state), state_host)

    print("KERNEL_OK")
</pallas_src>

<mosaic_0001>
module attributes {stable_mosaic.version = 11 : i64} {
  func.func @kernel(%arg0: memref<16x32xf32, #tpu.memory_space<any>>, %arg1: memref<16x32xf32, #tpu.memory_space<any>>, %arg2: memref<1x!tpu.dma_semaphore, #tpu.memory_space<semaphore_mem>>) attributes {dimension_semantics = [], scalar_prefetch = 0 : i64, scratch_operands = 1 : i64, tpu.core_type = #tpu.core_type<tc>} {
    %c0_i32 = arith.constant 0 : i32
    %c0_i32_0 = arith.constant 0 : i32
    %c0_i32_1 = arith.constant 0 : i32
    %0 = tpu.memref_slice %arg0[%c0_i32_0, %c0_i32_1] : memref<16x32xf32, #tpu.memory_space<any>> -> memref<16x32xf32, #tpu.memory_space<any>>
    %c0_i32_2 = arith.constant 0 : i32
    %c0_i32_3 = arith.constant 0 : i32
    %1 = tpu.memref_slice %arg1[%c0_i32_2, %c0_i32_3] : memref<16x32xf32, #tpu.memory_space<any>> -> memref<16x32xf32, #tpu.memory_space<any>>
    %2 = tpu.memref_slice %arg2[%c0_i32] : memref<1x!tpu.dma_semaphore, #tpu.memory_space<semaphore_mem>> -> memref<1x!tpu.dma_semaphore, #tpu.memory_space<semaphore_mem>>
    %3 = tpu.memref_squeeze %2 : memref<1x!tpu.dma_semaphore, #tpu.memory_space<semaphore_mem>> -> memref<!tpu.dma_semaphore, #tpu.memory_space<semaphore_mem>>
    tpu.enqueue_dma source(%0 : memref<16x32xf32, #tpu.memory_space<any>>) target(%1 : memref<16x32xf32, #tpu.memory_space<any>>) target_semaphore(%3 : memref<!tpu.dma_semaphore, #tpu.memory_space<semaphore_mem>>)
    %c0_i32_4 = arith.constant 0 : i32
    %c0_i32_5 = arith.constant 0 : i32
    %c0_i32_6 = arith.constant 0 : i32
    %4 = tpu.memref_slice %arg0[%c0_i32_5, %c0_i32_6] : memref<16x32xf32, #tpu.memory_space<any>> -> memref<16x32xf32, #tpu.memory_space<any>>
    %c0_i32_7 = arith.constant 0 : i32
    %c0_i32_8 = arith.constant 0 : i32
    %5 = tpu.memref_slice %arg1[%c0_i32_7, %c0_i32_8] : memref<16x32xf32, #tpu.memory_space<any>> -> memref<16x32xf32, #tpu.memory_space<any>>
    %6 = tpu.memref_slice %arg2[%c0_i32_4] : memref<1x!tpu.dma_semaphore, #tpu.memory_space<semaphore_mem>> -> memref<1x!tpu.dma_semaphore, #tpu.memory_space<semaphore_mem>>
    %7 = tpu.memref_squeeze %6 : memref<1x!tpu.dma_semaphore, #tpu.memory_space<semaphore_mem>> -> memref<!tpu.dma_semaphore, #tpu.memory_space<semaphore_mem>>
    tpu.wait_dma2 semaphore(%7 : memref<!tpu.dma_semaphore, #tpu.memory_space<semaphore_mem>>) src(%4 : memref<16x32xf32, #tpu.memory_space<any>>) dst(%5 : memref<16x32xf32, #tpu.memory_space<any>>)
    return
  }
}

</mosaic_0001>

<bundles_post_ra>
// kernel: tpu_custom_call.1
= control target key start
LH: loop header
LB: loop body
LE: loop exit
PB: predicated region body
PF: predicated region fallthrough
CT: control target
= control target key end

     0   :  { %s28_s6 = smov [#allocation2]   ;;  %s29_s7 = smov 131072   ;;  %s47_s0 = inlined_call_operand.hbm [shape: f32[16,32], index: 0, kind: input, shape index: {}]   ;;  %s48_s1 = inlined_call_operand.hbm [shape: f32[16,32], index: 1, kind: output, shape index: {}]  }
   0x1   :  { %s30_s8 = smov 0  }
   0x2   :  { %12 = dma.general %s47_s0, 256, %s48_s1, %s28_s6, %s29_s7, [#allocation4], %s30_s8, 0  }
   0x3   :  { %26 = dma.done.wait [#allocation2], 256 }
   0x4   :  { %27 = vsyncadd [#allocation2], 4294967040 }
   0x5   :  { %16 = vsyncmov [#allocation2] }
   0x8   :  { %s17_s13 = vpop.sfrf %16 }
   0x9   :  { %p22_p0 = scmp.ne.s32.totalorder %s17_s13, 0 }
   0xb   :  { %21 = shalt.err (%p22_p0)  }

</bundles_post_ra>
